<compile_context>
chip_gen: v5e
topology: v5e:2x2
jax: 0.10.0
libtpu: 0.0.40
codegen_flags: <defaults>
</compile_context>

<pallas_src>
import jax
import jax.numpy as jnp
from jax.experimental import pallas as pl
from jax.experimental.pallas import tpu as pltpu


def _make_rnn_kernel(seq, batch):
    """Build the kernel with static seq / (padded) batch baked in."""

    def rnn_kernel(tok_ref, h0_ref, wih_t_ref, whh_t_ref, b_ref, wd_t_ref, bd_ref,
                   out_ref, hout_ref):
        """Full recurrence + fused dense projection in one invocation.

        tok_ref:   (seq*batch, 1)   int32  time-major flattened token ids
        h0_ref:    (batch, hidden)  f32
        wih_t_ref: (vocab, hidden)  f32    W_ih^T
        whh_t_ref: (hidden, hidden) f32    W_hh^T
        b_ref:     (1, hidden)      f32    b_ih + b_hh (folded)
        wd_t_ref:  (hidden, Vpad)   f32    W_dense^T, vocab zero-padded to 128
        bd_ref:    (1, Vpad)        f32
        out_ref:   (seq*batch, Vpad)f32    logits (lane-dense store)
        hout_ref:  (batch, hidden)  f32    final hidden state
        """
        vocab = wih_t_ref.shape[0]
        sb = seq * batch

        # ---------- prologue: everything with no dependence on h ----------
        # one_hot(x) @ W_ih^T for ALL timesteps at once, via an iota == token
        # compare (no per-step gathers / concats on the serial path).
        tok = tok_ref[...]                                            # (S*B, 1)
        iota = jax.lax.broadcasted_iota(jnp.int32, (sb, vocab), 1)
        onehot = (iota == tok).astype(jnp.float32)                    # (S*B, V)
        x_all = (jnp.dot(onehot, wih_t_ref[...],
                         preferred_element_type=jnp.float32)
                 + b_ref[...])                                        # (S*B, H)
        whh = whh_t_ref[...]                                          # load once

        # ---------- serial recurrence: only matmul + add + tanh ----------
        h = h0_ref[...]                                               # (B, H)
        hs = []
        for t in range(seq):                                          # full unroll
            x_t = x_all[t * batch:(t + 1) * batch, :]                 # static, 8-aligned
            h = jnp.tanh(x_t + jnp.dot(h, whh,
                                       preferred_element_type=jnp.float32))
            hs.append(h)                                              # stays in vregs

        hout_ref[...] = h                                             # final state, once

        # ---------- epilogue: single dense matmul, lane-dense writeback ----------
        h_all = jnp.concatenate(hs, axis=0)                           # (S*B, H)
        out_ref[...] = (jnp.dot(h_all, wd_t_ref[...],
                                preferred_element_type=jnp.float32)
                        + bd_ref[...])

    return rnn_kernel


def rnn_model_forward(tokens, h0, w_ih, w_hh, b_ih, b_hh, w_dense, b_dense,
                      vocab_size):
    """tokens: (batch, seq) int; h0: (1, batch, hidden).

    Returns (output, state): output (seq*batch, vocab), state (1, batch, hidden),
    matching RNNModel.forward semantics.
    """
    batch, seq = tokens.shape
    hidden = w_hh.shape[0]

    # Sublane fill / lane-dense padding (layout plumbing only, outside the kernel).
    b_pad = max(8, ((batch + 7) // 8) * 8)          # fill the 8 sublanes
    v_pad = max(128, ((vocab_size + 127) // 128) * 128)  # lane-dense logits store

    tokens_p = jnp.zeros((b_pad, seq), jnp.int32).at[:batch].set(
        tokens.astype(jnp.int32))
    h0_p = jnp.zeros((b_pad, hidden), jnp.float32).at[:batch].set(h0[0])
    tok_tm = tokens_p.T.reshape(seq * b_pad, 1)     # time-major: row t*B + b

    wih_t = w_ih.T                                  # (V, H) — plain 2-D layout
    whh_t = w_hh.T                                  # (H, H)
    b_rec = (b_ih + b_hh).reshape(1, hidden)        # folded recurrence bias
    wd_t_p = jnp.zeros((hidden, v_pad), jnp.float32).at[:, :vocab_size].set(w_dense.T)
    bd_p = jnp.zeros((1, v_pad), jnp.float32).at[:, :vocab_size].set(
        b_dense.reshape(1, vocab_size))

    const2 = lambda i: (0, 0)
    kernel = _make_rnn_kernel(seq, b_pad)

    logits_p, h_last_p = pl.pallas_call(
        kernel,
        out_shape=(
            jax.ShapeDtypeStruct((seq * b_pad, v_pad), jnp.float32),
            jax.ShapeDtypeStruct((b_pad, hidden), jnp.float32),
        ),
        grid_spec=pltpu.PrefetchScalarGridSpec(
            num_scalar_prefetch=0,
            grid=(1,),                              # whole problem in one invocation
            in_specs=[
                pl.BlockSpec((seq * b_pad, 1), const2),       # tokens (time-major)
                pl.BlockSpec((b_pad, hidden), const2),        # h0
                pl.BlockSpec((vocab_size, hidden), const2),   # W_ih^T
                pl.BlockSpec((hidden, hidden), const2),       # W_hh^T
                pl.BlockSpec((1, hidden), const2),            # b_ih + b_hh
                pl.BlockSpec((hidden, v_pad), const2),        # W_d^T (vocab padded)
                pl.BlockSpec((1, v_pad), const2),             # b_d   (vocab padded)
            ],
            out_specs=[
                pl.BlockSpec((seq * b_pad, v_pad), const2),   # logits (lane-dense)
                pl.BlockSpec((b_pad, hidden), const2),        # final state
            ],
        ),
        compiler_params=pltpu.CompilerParams(
            dimension_semantics=("arbitrary",)),
        # TODO(synk): at production sizes on v7x, add a "parallel" batch-tile grid
        # axis (2 TCs) and set vmem_limit_bytes for the 64 MiB budget.
    )(tok_tm, h0_p, wih_t, whh_t, b_rec, wd_t_p, bd_p)

    # Strip batch/vocab padding; restore time-major (t*batch + b) row order.
    logits = logits_p.reshape(seq, b_pad, v_pad)[:, :batch, :vocab_size]
    logits = logits.reshape(seq * batch, vocab_size)
    state = h_last_p[:batch][None]                  # (1, B, H)
    return logits, state


def reference_forward(tokens, h0, w_ih, w_hh, b_ih, b_hh, w_dense, b_dense,
                      vocab_size):
    """Pure-JAX reference reproducing nn.RNN(tanh) + Linear semantics."""
    x_oh = jnp.transpose(jax.nn.one_hot(tokens, vocab_size, dtype=jnp.float32),
                         (1, 0, 2))                 # (S,B,V), time-major

    def step(h, x_t):
        h_new = jnp.tanh(x_t @ w_ih.T + b_ih + h @ w_hh.T + b_hh)
        return h_new, h_new

    h_last, ys = jax.lax.scan(step, h0[0], x_oh)    # ys: (S,B,H)
    out = ys.reshape(-1, ys.shape[-1]) @ w_dense.T + b_dense
    return out, h_last[None]


if __name__ == "__main__":
    batch, seq, vocab, hidden = 2, 8, 16, 32

    key = jax.random.PRNGKey(0)
    ks = jax.random.split(key, 8)
    bound = 1.0 / (hidden ** 0.5)

    # nn.RNN(input_size=vocab, hidden_size=hidden) parameters (deterministic)
    w_ih = jax.random.uniform(ks[0], (hidden, vocab), jnp.float32, -bound, bound)
    w_hh = jax.random.uniform(ks[1], (hidden, hidden), jnp.float32, -bound, bound)
    b_ih = jax.random.uniform(ks[2], (hidden,), jnp.float32, -bound, bound)
    b_hh = jax.random.uniform(ks[3], (hidden,), jnp.float32, -bound, bound)
    # nn.Linear(hidden, vocab) parameters
    w_dense = jax.random.uniform(ks[4], (vocab, hidden), jnp.float32, -bound, bound)
    b_dense = jax.random.uniform(ks[5], (vocab,), jnp.float32, -bound, bound)

    tokens = jax.random.randint(ks[6], (batch, seq), 0, vocab, dtype=jnp.int32)
    h0 = jax.random.normal(ks[7], (1, batch, hidden), jnp.float32)

    out, state = rnn_model_forward(tokens, h0, w_ih, w_hh, b_ih, b_hh,
                                   w_dense, b_dense, vocab)
    out = jax.block_until_ready(out)
    state = jax.block_until_ready(state)

    ref_out, ref_state = reference_forward(tokens, h0, w_ih, w_hh, b_ih, b_hh,
                                           w_dense, b_dense, vocab)

    assert out.shape == (seq * batch, vocab)
    assert state.shape == (1, batch, hidden)
    assert jnp.allclose(out, ref_out, atol=1e-5, rtol=1e-5)
    assert jnp.allclose(state, ref_state, atol=1e-5, rtol=1e-5)

    print("KERNEL_OK")
</pallas_src>

<mosaic_0001>
module attributes {stable_mosaic.version = 11 : i64} {
  func.func @rnn_kernel(%arg0: i32, %arg1: memref<64x1xi32, #tpu.memory_space<vmem>>, %arg2: memref<8x32xf32, #tpu.memory_space<vmem>>, %arg3: memref<16x32xf32, #tpu.memory_space<vmem>>, %arg4: memref<32x32xf32, #tpu.memory_space<vmem>>, %arg5: memref<1x32xf32, #tpu.memory_space<vmem>>, %arg6: memref<32x128xf32, #tpu.memory_space<vmem>>, %arg7: memref<1x128xf32, #tpu.memory_space<vmem>>, %arg8: memref<64x128xf32, #tpu.memory_space<vmem>>, %arg9: memref<8x32xf32, #tpu.memory_space<vmem>>) attributes {dimension_semantics = [#tpu.dimension_semantics<arbitrary>], iteration_bounds = array<i64: 1>, scalar_prefetch = 0 : i64, scratch_operands = 0 : i64, tpu.core_type = #tpu.core_type<tc>, window_params = [{pipeline_mode = #tpu.pipeline_mode<synchronous>, transform_indices = @transform_0, window_bounds = array<i64: 64, 1>}, {pipeline_mode = #tpu.pipeline_mode<synchronous>, transform_indices = @transform_1, window_bounds = array<i64: 8, 32>}, {pipeline_mode = #tpu.pipeline_mode<synchronous>, transform_indices = @transform_2, window_bounds = array<i64: 16, 32>}, {pipeline_mode = #tpu.pipeline_mode<synchronous>, transform_indices = @transform_3, window_bounds = array<i64: 32, 32>}, {pipeline_mode = #tpu.pipeline_mode<synchronous>, transform_indices = @transform_4, window_bounds = array<i64: 1, 32>}, {pipeline_mode = #tpu.pipeline_mode<synchronous>, transform_indices = @transform_5, window_bounds = array<i64: 32, 128>}, {pipeline_mode = #tpu.pipeline_mode<synchronous>, transform_indices = @transform_6, window_bounds = array<i64: 1, 128>}, {pipeline_mode = #tpu.pipeline_mode<synchronous>, transform_indices = @transform_7, window_bounds = array<i64: 64, 128>}, {pipeline_mode = #tpu.pipeline_mode<synchronous>, transform_indices = @transform_8, window_bounds = array<i64: 8, 32>}]} {
    %c0 = arith.constant 0 : index
    %c0_0 = arith.constant 0 : index
    %0 = vector.load %arg1[%c0, %c0_0] : memref<64x1xi32, #tpu.memory_space<vmem>>, vector<64x1xi32>
    %1 = tpu.iota {dimensions = array<i32: 1>} : vector<64x16xi32>
    %2 = vector.broadcast %0 : vector<64x1xi32> to vector<64x16xi32>
    %3 = arith.cmpi eq, %1, %2 : vector<64x16xi32>
    %4 = arith.extui %3 : vector<64x16xi1> to vector<64x16xi32>
    %5 = arith.sitofp %4 : vector<64x16xi32> to vector<64x16xf32>
    %c0_1 = arith.constant 0 : index
    %c0_2 = arith.constant 0 : index
    %6 = vector.load %arg3[%c0_1, %c0_2] : memref<16x32xf32, #tpu.memory_space<vmem>>, vector<16x32xf32>
    %cst = arith.constant dense<0.000000e+00> : vector<64x32xf32>
    %7 = tpu.matmul %5, %6, %cst {dimension_numbers = #tpu.dot_dimension_numbers<[1], [0], [0], [1], [0, 0, 1, 1], [], []>} : vector<64x16xf32>, vector<16x32xf32>, vector<64x32xf32> -> vector<64x32xf32>
    %c0_3 = arith.constant 0 : index
    %c0_4 = arith.constant 0 : index
    %8 = vector.load %arg5[%c0_3, %c0_4] : memref<1x32xf32, #tpu.memory_space<vmem>>, vector<1x32xf32>
    %9 = vector.broadcast %8 : vector<1x32xf32> to vector<64x32xf32>
    %10 = arith.addf %7, %9 : vector<64x32xf32>
    %c0_5 = arith.constant 0 : index
    %c0_6 = arith.constant 0 : index
    %11 = vector.load %arg4[%c0_5, %c0_6] : memref<32x32xf32, #tpu.memory_space<vmem>>, vector<32x32xf32>
    %c0_7 = arith.constant 0 : index
    %c0_8 = arith.constant 0 : index
    %12 = vector.load %arg2[%c0_7, %c0_8] : memref<8x32xf32, #tpu.memory_space<vmem>>, vector<8x32xf32>
    %13 = vector.extract_strided_slice %10 {offsets = [0, 0], sizes = [8, 32], strides = [1, 1]} : vector<64x32xf32> to vector<8x32xf32>
    %cst_9 = arith.constant dense<0.000000e+00> : vector<8x32xf32>
    %14 = tpu.matmul %12, %11, %cst_9 {dimension_numbers = #tpu.dot_dimension_numbers<[1], [0], [0], [1], [0, 0, 1, 1], [], []>} : vector<8x32xf32>, vector<32x32xf32>, vector<8x32xf32> -> vector<8x32xf32>
    %15 = arith.addf %13, %14 : vector<8x32xf32>
    %16 = math.tanh %15 : vector<8x32xf32>
    %17 = vector.extract_strided_slice %10 {offsets = [8, 0], sizes = [8, 32], strides = [1, 1]} : vector<64x32xf32> to vector<8x32xf32>
    %cst_10 = arith.constant dense<0.000000e+00> : vector<8x32xf32>
    %18 = tpu.matmul %16, %11, %cst_10 {dimension_numbers = #tpu.dot_dimension_numbers<[1], [0], [0], [1], [0, 0, 1, 1], [], []>} : vector<8x32xf32>, vector<32x32xf32>, vector<8x32xf32> -> vector<8x32xf32>
    %19 = arith.addf %17, %18 : vector<8x32xf32>
    %20 = math.tanh %19 : vector<8x32xf32>
    %21 = vector.extract_strided_slice %10 {offsets = [16, 0], sizes = [8, 32], strides = [1, 1]} : vector<64x32xf32> to vector<8x32xf32>
    %cst_11 = arith.constant dense<0.000000e+00> : vector<8x32xf32>
    %22 = tpu.matmul %20, %11, %cst_11 {dimension_numbers = #tpu.dot_dimension_numbers<[1], [0], [0], [1], [0, 0, 1, 1], [], []>} : vector<8x32xf32>, vector<32x32xf32>, vector<8x32xf32> -> vector<8x32xf32>
    %23 = arith.addf %21, %22 : vector<8x32xf32>
    %24 = math.tanh %23 : vector<8x32xf32>
    %25 = vector.extract_strided_slice %10 {offsets = [24, 0], sizes = [8, 32], strides = [1, 1]} : vector<64x32xf32> to vector<8x32xf32>
    %cst_12 = arith.constant dense<0.000000e+00> : vector<8x32xf32>
    %26 = tpu.matmul %24, %11, %cst_12 {dimension_numbers = #tpu.dot_dimension_numbers<[1], [0], [0], [1], [0, 0, 1, 1], [], []>} : vector<8x32xf32>, vector<32x32xf32>, vector<8x32xf32> -> vector<8x32xf32>
    %27 = arith.addf %25, %26 : vector<8x32xf32>
    %28 = math.tanh %27 : vector<8x32xf32>
    %29 = vector.extract_strided_slice %10 {offsets = [32, 0], sizes = [8, 32], strides = [1, 1]} : vector<64x32xf32> to vector<8x32xf32>
    %cst_13 = arith.constant dense<0.000000e+00> : vector<8x32xf32>
    %30 = tpu.matmul %28, %11, %cst_13 {dimension_numbers = #tpu.dot_dimension_numbers<[1], [0], [0], [1], [0, 0, 1, 1], [], []>} : vector<8x32xf32>, vector<32x32xf32>, vector<8x32xf32> -> vector<8x32xf32>
    %31 = arith.addf %29, %30 : vector<8x32xf32>
    %32 = math.tanh %31 : vector<8x32xf32>
    %33 = vector.extract_strided_slice %10 {offsets = [40, 0], sizes = [8, 32], strides = [1, 1]} : vector<64x32xf32> to vector<8x32xf32>
    %cst_14 = arith.constant dense<0.000000e+00> : vector<8x32xf32>
    %34 = tpu.matmul %32, %11, %cst_14 {dimension_numbers = #tpu.dot_dimension_numbers<[1], [0], [0], [1], [0, 0, 1, 1], [], []>} : vector<8x32xf32>, vector<32x32xf32>, vector<8x32xf32> -> vector<8x32xf32>
    %35 = arith.addf %33, %34 : vector<8x32xf32>
    %36 = math.tanh %35 : vector<8x32xf32>
    %37 = vector.extract_strided_slice %10 {offsets = [48, 0], sizes = [8, 32], strides = [1, 1]} : vector<64x32xf32> to vector<8x32xf32>
    %cst_15 = arith.constant dense<0.000000e+00> : vector<8x32xf32>
    %38 = tpu.matmul %36, %11, %cst_15 {dimension_numbers = #tpu.dot_dimension_numbers<[1], [0], [0], [1], [0, 0, 1, 1], [], []>} : vector<8x32xf32>, vector<32x32xf32>, vector<8x32xf32> -> vector<8x32xf32>
    %39 = arith.addf %37, %38 : vector<8x32xf32>
    %40 = math.tanh %39 : vector<8x32xf32>
    %41 = vector.extract_strided_slice %10 {offsets = [56, 0], sizes = [8, 32], strides = [1, 1]} : vector<64x32xf32> to vector<8x32xf32>
    %cst_16 = arith.constant dense<0.000000e+00> : vector<8x32xf32>
    %42 = tpu.matmul %40, %11, %cst_16 {dimension_numbers = #tpu.dot_dimension_numbers<[1], [0], [0], [1], [0, 0, 1, 1], [], []>} : vector<8x32xf32>, vector<32x32xf32>, vector<8x32xf32> -> vector<8x32xf32>
    %43 = arith.addf %41, %42 : vector<8x32xf32>
    %44 = math.tanh %43 : vector<8x32xf32>
    %c0_17 = arith.constant 0 : index
    %c0_18 = arith.constant 0 : index
    %45 = vector.load %arg9[%c0_17, %c0_18] : memref<8x32xf32, #tpu.memory_space<vmem>>, vector<8x32xf32>
    tpu.vector_store %arg9[%c0_17, %c0_18], %44 {strides = array<i32>} : memref<8x32xf32, #tpu.memory_space<vmem>>, vector<8x32xf32>,
    %46 = tpu.concatenate %16, %20, %24, %28, %32, %36, %40, %44 in 0 : vector<8x32xf32>, vector<8x32xf32>, vector<8x32xf32>, vector<8x32xf32>, vector<8x32xf32>, vector<8x32xf32>, vector<8x32xf32>, vector<8x32xf32> -> vector<64x32xf32>
    %c0_19 = arith.constant 0 : index
    %c0_20 = arith.constant 0 : index
    %47 = vector.load %arg6[%c0_19, %c0_20] : memref<32x128xf32, #tpu.memory_space<vmem>>, vector<32x128xf32>
    %cst_21 = arith.constant dense<0.000000e+00> : vector<64x128xf32>
    %48 = tpu.matmul %46, %47, %cst_21 {dimension_numbers = #tpu.dot_dimension_numbers<[1], [0], [0], [1], [0, 0, 1, 1], [], []>} : vector<64x32xf32>, vector<32x128xf32>, vector<64x128xf32> -> vector<64x128xf32>
    %c0_22 = arith.constant 0 : index
    %c0_23 = arith.constant 0 : index
    %49 = vector.load %arg7[%c0_22, %c0_23] : memref<1x128xf32, #tpu.memory_space<vmem>>, vector<1x128xf32>
    %50 = vector.broadcast %49 : vector<1x128xf32> to vector<64x128xf32>
    %51 = arith.addf %48, %50 : vector<64x128xf32>
    %c0_24 = arith.constant 0 : index
    %c0_25 = arith.constant 0 : index
    %52 = vector.load %arg8[%c0_24, %c0_25] : memref<64x128xf32, #tpu.memory_space<vmem>>, vector<64x128xf32>
    tpu.vector_store %arg8[%c0_24, %c0_25], %51 {strides = array<i32>} : memref<64x128xf32, #tpu.memory_space<vmem>>, vector<64x128xf32>,
    return
  }
  func.func @transform_0(%arg0: i32) -> (i32, i32) {
    %c0_i32 = arith.constant 0 : i32
    %c0_i32_0 = arith.constant 0 : i32
    %c0_i32_1 = arith.constant 0 : i32
    return %c0_i32, %c0_i32_0 : i32, i32
  }
  func.func @transform_1(%arg0: i32) -> (i32, i32) {
    %c0_i32 = arith.constant 0 : i32
    %c0_i32_0 = arith.constant 0 : i32
    %c0_i32_1 = arith.constant 0 : i32
    return %c0_i32, %c0_i32_0 : i32, i32
  }
  func.func @transform_2(%arg0: i32) -> (i32, i32) {
    %c0_i32 = arith.constant 0 : i32
    %c0_i32_0 = arith.constant 0 : i32
    %c0_i32_1 = arith.constant 0 : i32
    return %c0_i32, %c0_i32_0 : i32, i32
  }
  func.func @transform_3(%arg0: i32) -> (i32, i32) {
    %c0_i32 = arith.constant 0 : i32
    %c0_i32_0 = arith.constant 0 : i32
    %c0_i32_1 = arith.constant 0 : i32
    return %c0_i32, %c0_i32_0 : i32, i32
  }
  func.func @transform_4(%arg0: i32) -> (i32, i32) {
    %c0_i32 = arith.constant 0 : i32
    %c0_i32_0 = arith.constant 0 : i32
    %c0_i32_1 = arith.constant 0 : i32
    return %c0_i32, %c0_i32_0 : i32, i32
  }
  func.func @transform_5(%arg0: i32) -> (i32, i32) {
    %c0_i32 = arith.constant 0 : i32
    %c0_i32_0 = arith.constant 0 : i32
    %c0_i32_1 = arith.constant 0 : i32
    return %c0_i32, %c0_i32_0 : i32, i32
  }
  func.func @transform_6(%arg0: i32) -> (i32, i32) {
    %c0_i32 = arith.constant 0 : i32
    %c0_i32_0 = arith.constant 0 : i32
    %c0_i32_1 = arith.constant 0 : i32
    return %c0_i32, %c0_i32_0 : i32, i32
  }
  func.func @transform_7(%arg0: i32) -> (i32, i32) {
    %c0_i32 = arith.constant 0 : i32
    %c0_i32_0 = arith.constant 0 : i32
    %c0_i32_1 = arith.constant 0 : i32
    return %c0_i32, %c0_i32_0 : i32, i32
  }
  func.func @transform_8(%arg0: i32) -> (i32, i32) {
    %c0_i32 = arith.constant 0 : i32
    %c0_i32_0 = arith.constant 0 : i32
    %c0_i32_1 = arith.constant 0 : i32
    return %c0_i32, %c0_i32_0 : i32, i32
  }
}

</mosaic_0001>

<bundles_post_ra>
// kernel: tpu_custom_call.1
= control target key start
LH: loop header
LB: loop body
LE: loop exit
PB: predicated region body
PF: predicated region fallthrough
CT: control target
= control target key end

     0   :  { %14 = vsyncpa [#allocation3], 0  ;;  %s867_s0 = inlined_call_operand.vmem [shape: s32[64,1], index: 0, kind: input, shape index: {}]   ;;  %s868_s1 = inlined_call_operand.hbm [shape: f32[8,32], index: 1, kind: input, shape index: {}]   ;;  %s869_s2 = inlined_call_operand.hbm [shape: f32[16,32], index: 2, kind: input, shape index: {}]   ;;  %s870_s3 = inlined_call_operand.vmem [shape: f32[32,32], index: 3, kind: input, shape index: {}]   ;;  %s871_s4 = inlined_call_operand.vmem [shape: f32[1,32], index: 4, kind: input, shape index: {}]   ;;  %s872_s5 = inlined_call_operand.vmem [shape: f32[32,128], index: 5, kind: input, shape index: {}]   ;;  %s873_s6 = inlined_call_operand.vmem [shape: f32[1,128], index: 6, kind: input, shape index: {}]   ;;  %s874_s7 = inlined_call_operand.hbm [shape: f32[64,128], index: 7, kind: output, shape index: {0}]   ;;  %s875_s8 = inlined_call_operand.hbm [shape: f32[8,32], index: 8, kind: output, shape index: {1}]  }
   0x1   :  { %15 = vsyncpa [#allocation6], 0 }
   0x2   :  { %16 = vsyncpa [#allocation4], 0 }
   0x3   :  { %17 = vsyncpa [#allocation9], 0  ;;  %s25_s29 = sshll.u32 %s868_s1, 4  ;;  %s664_s30 = smov [#allocation2]   ;;  %s26_s29 = int_to_ptr.hbm [resolvable:$true] %s25_s29 }
   0x4   :  { %s27_s9 = sshll.u32 %s664_s30, 4  ;;  %s35_s12 = sshll.u32 %s869_s2, 4  ;;  %s28_s9 = int_to_ptr.vmem [resolvable:$true] %s27_s9  ;;  %s36_s12 = int_to_ptr.hbm [resolvable:$true] %s35_s12 }
   0x5   :  { %30 = dma.hbm_to_vmem [thread:$0]  %s26_s29, 128, %s28_s9, [#allocation3]  }
   0x6   :  { %s665_s13 = smov [#allocation5]   ;;  %s666_s15 = smov 128  }
   0x7   :  { %s37_s14 = sshll.u32 %s665_s13, 4  ;;  %s667_s16 = smov 8   ;;  %s38_s14 = int_to_ptr.vmem [resolvable:$true] %s37_s14 }
   0x8   :  { %43 = dma.hbm_to_vmem [thread:$0]  %s36_s12, 256, %s38_s14, [#allocation6], %s666_s15, %s666_s15, %s667_s16  }
   0x9   :  { %656 = dma.done.wait [#allocation3], 128  }
   0xa   :  { %657 = vsyncadd [#allocation3], 4294967168 }
   0xb   :  { %658 = dma.done.wait [#allocation6], 256  }
   0xc   :  { %659 = vsyncadd [#allocation6], 4294967040  ;;  %v668_v0 = vmov 0   ;;  %v67_v1 = vld [vmem:[%s867_s0 + $0x38] sm:$0xff]  ;;  %v61_v2 = vld [vmem:[%s867_s0 + $0x8] sm:$0xff]  ;;  %v68_v14 = vlaneseq  ;;  %vm124_vm0 = vcmask 130048  }
   0xd   :  { %539 = vset.pattern.permute.xlu0 %v668_v0  ;;  %540 = vset.pattern.permute.xlu1 %v668_v0  ;;  %v63_v3 = vld [vmem:[%s867_s0 + $0x18] sm:$0xff]  ;;  %v119_v4 = vld [vmem:[#allocation5 + $0x8] sm:$0xff]  ;;  %v60_v5 = vld [vmem:[%s867_s0] sm:$0xff]  ;;  %v669_v17 = vmov 0.0   ;;  %vm195_vm2 = vcmask 261120   ;;  %s477_s28 = sshll.u32 %s875_s8, 4  ;;  %s478_s28 = int_to_ptr.hbm [resolvable:$true] %s477_s28 }
   0xe   :  { %541 = vset.pattern.permute.xlu2 %v668_v0  ;;  %92 = vperm.xlu0 %539, %v67_v1   ;;  %v62_v6 = vld [vmem:[%s867_s0 + $0x10] sm:$0xff]  ;;  %v64_v7 = vld [vmem:[%s867_s0 + $0x20] sm:$0xff]  ;;  %v65_v8 = vld [vmem:[%s867_s0 + $0x28] sm:$0xff]  ;;  %v69_v15 = vand.u32 127, %v68_v14  ;;  %s671_s29 = smov [#allocation7]   ;;  %s463_s11 = sshll.u32 %s874_s7, 4  ;;  %s464_s11 = int_to_ptr.hbm [resolvable:$true] %s463_s11 }
   0xf   :  { %74 = vperm.xlu1 %540, %v61_v2   ;;  %80 = vperm.xlu2 %541, %v63_v3   ;;  %v118_v9 = vld [vmem:[#allocation5] sm:$0xff]  ;;  %v750_v10 = vld [vmem:[%s870_s3 + $0x18] sm:$0xff]  ;;  %v755_v11 = vld [vmem:[%s870_s3 + $0x10] sm:$0xff]  ;;  %s461_s30 = sshll.u32 %s671_s29, 4  ;;  %s462_s30 = int_to_ptr.vmem [resolvable:$true] %s461_s30 }
  0x10   :  { %525 = vmatpush.msra.mxu2 %v119_v4  ;;  %163 = vmatpush.msra.mxu0 %v119_v4  ;;  %v762_v12 = vld [vmem:[%s870_s3 + $0x8] sm:$0xff]  ;;  %v773_v13 = vld [vmem:[%s870_s3] sm:$0xff]  ;;  %v66_v19 = vld [vmem:[%s867_s0 + $0x30] sm:$0xff] }
  0x11   :  { %261 = vmatpush.msra.mxu3 %v750_v10  ;;  %286 = vmatpush.msra.mxu1 %v750_v10  ;;  %v194_v21 = vld [vmem:[#allocation2] sm:$0xff]  ;;  %v400_v57 = vld [vmem:[%s872_s5 + $0x18] sm:$0xff]  ;;  %v399_v58 = vld [vmem:[%s872_s5 + $0x10] sm:$0xff] }
  0x12   :  { %526 = vmatpush.msra.mxu2 %v118_v9  ;;  %164 = vmatpush.msra.mxu0 %v118_v9  ;;  %v812_v37 = vld [vmem:[%s871_s4] ss:$0 sm:$0xff]  ;;  %v398_v59 = vld [vmem:[%s872_s5 + $0x8] sm:$0xff] }
  0x13   :  { %262 = vmatpush.msra.mxu3 %v755_v11  ;;  %287 = vmatpush.msra.mxu1 %v755_v11  ;;  %v397_v60 = vld [vmem:[%s872_s5] sm:$0xff] }
  0x14   :  { %211 = vmatpush.msrb.mxu2 %v750_v10 }
  0x15   :  { %263 = vmatpush.msra.mxu3 %v762_v12  ;;  %288 = vmatpush.msra.mxu1 %v762_v12 }
  0x16   :  { %71 = vperm.xlu0 %539, %v60_v5   ;;  %212 = vmatpush.msrb.mxu2 %v755_v11 }
  0x17   :  { %77 = vperm.xlu1 %540, %v62_v6   ;;  %83 = vperm.xlu2 %541, %v64_v7   ;;  %v543_v6 = vld [vmem:[%s873_s6] ss:$0 sm:$0xff]  ;;  %s670_s6 = smov [#allocation8]  }
  0x18   :  { %213 = vmatpush.msrb.mxu2 %v762_v12  ;;  %264 = vmatpush.msra.mxu3 %v773_v13  ;;  %s475_s25 = sshll.u32 %s670_s6, 4  ;;  %s476_s25 = int_to_ptr.vmem [resolvable:$true] %s475_s25 }
  0x19   :  { %289 = vmatpush.msra.mxu1 %v773_v13 }
  0x1a   :  { %214 = vmatpush.msrb.mxu2 %v773_v13  ;;  %336 = vmatpush.msrb.mxu3 %v750_v10 }
  0x1b   :  { %361 = vmatpush.msrb.mxu1 %v750_v10 }
  0x1c   :  { %337 = vmatpush.msrb.mxu3 %v755_v11 }
  0x1d   :  { %362 = vmatpush.msrb.mxu1 %v755_v11 }
  0x1e   :  { %86 = vperm.xlu0 %539, %v65_v8   ;;  %338 = vmatpush.msrb.mxu3 %v762_v12 }
  0x1f   :  { %363 = vmatpush.msrb.mxu1 %v762_v12  ;;  %89 = vperm.xlu1 %540, %v66_v19  }
  0x20   :  { %339 = vmatpush.msrb.mxu3 %v773_v13 }
  0x21   :  { %364 = vmatpush.msrb.mxu1 %v773_v13 }
  0x69   :  { %v81_v27 = vpop.permute.xlu2 %80 }
  0x6a   :  { %vm97_vm6 = vcmp.eq.s32.totalorder %v69_v15, %v81_v27 }
  0x6b   :  { %v496_v28 = vsel %vm97_vm6, 1.0, %v669_v17 }
  0x71   :  { %v84_v29 = vpop.permute.xlu2 %83 }
  0x72   :  { %vm98_vm7 = vcmp.eq.s32.totalorder %v69_v15, %v84_v29 }
  0x73   :  { %v497_v30 = vsel %vm98_vm7, 1.0, %v669_v17 }
  0x80   :  { %v93_v16 = vpop.permute.xlu0 %92 }
  0x81   :  { %vm101_vm1 = vcmp.eq.s32.totalorder %v69_v15, %v93_v16  ;;  %v75_v22 = vpop.permute.xlu1 %74 }
  0x82   :  { %v500_v18 = vsel %vm101_vm1, 1.0, %v669_v17  ;;  %vm95_vm4 = vcmp.eq.s32.totalorder %v69_v15, %v75_v22 }
  0x83   :  { %508 = vmatmul.msk.f32.vlgmr.msra.gmra.mxu2 %vm124_vm0, %v500_v18  ;;  %v494_v24 = vsel %vm95_vm4, 1.0, %v669_v17 }
  0x84   :  { %236 = vmatpush.msra.mxu2 %v750_v10 }
  0x86   :  { %237 = vmatpush.msra.mxu2 %v755_v11 }
  0x88   :  { %v72_v20 = vpop.permute.xlu0 %71  ;;  %238 = vmatpush.msra.mxu2 %v762_v12 }
  0x89   :  { %vm94_vm3 = vcmp.eq.s32.totalorder %v69_v15, %v72_v20  ;;  %v78_v25 = vpop.permute.xlu1 %77 }
  0x8a   :  { %v493_v23 = vsel %vm94_vm3, 1.0, %v669_v17  ;;  %239 = vmatpush.msra.mxu2 %v773_v13  ;;  %vm96_vm5 = vcmp.eq.s32.totalorder %v69_v15, %v78_v25 }
  0x8b   :  { %501 = vmatmul.msk.f32.vlgmr.msra.gmra.mxu0 %vm124_vm0, %v493_v23  ;;  %509 = vmatmul.msk.f32.vlgmr.msrb.gmra.mxu2 %vm195_vm2, %v194_v21  ;;  %v495_v26 = vsel %vm96_vm5, 1.0, %v669_v17 }
  0x8c   :  { %311 = vmatpush.msrb.mxu2 %v750_v10 }
  0x8e   :  { %312 = vmatpush.msrb.mxu2 %v755_v11 }
  0x90   :  { %313 = vmatpush.msrb.mxu2 %v762_v12  ;;  %v87_v31 = vpop.permute.xlu0 %86 }
  0x91   :  { %vm99_vm8 = vcmp.eq.s32.totalorder %v69_v15, %v87_v31  ;;  %v90_v33 = vpop.permute.xlu1 %89 }
  0x92   :  { %314 = vmatpush.msrb.mxu2 %v773_v13  ;;  %v498_v32 = vsel %vm99_vm8, 1.0, %v669_v17  ;;  %vm100_vm9 = vcmp.eq.s32.totalorder %v69_v15, %v90_v33 }
  0x93   :  { %502 = vmatmul.msk.f32.gmra.mxu0 %vm124_vm0, %v494_v24  ;;  %v499_v34 = vsel %vm100_vm9, 1.0, %v669_v17 }
  0x9b   :  { %503 = vmatmul.msk.f32.gmra.mxu0 %vm124_vm0, %v495_v26 }
  0xa3   :  { %504 = vmatmul.msk.f32.gmra.mxu0 %vm124_vm0, %v496_v28 }
  0xab   :  { %505 = vmatmul.msk.f32.gmra.mxu0 %vm124_vm0, %v497_v30 }
  0xb3   :  { %506 = vmatmul.msk.f32.gmra.mxu0 %vm124_vm0, %v498_v32 }
  0xbb   :  { %507 = vmatmul.msk.f32.gmra.mxu0 %vm124_vm0, %v499_v34 }
 0x106   :  { %v807_v35 = vpop.f32.mrf.mxu2 }
 0x107   :  { %v188_v25 = vadd.f32 %v812_v37, %v807_v35 }
 0x108   :  { %v166_v36 = vpop.f32.mrf.mxu0 }
 0x109   :  { %v167_v38 = vadd.f32 %v812_v37, %v166_v36 }
 0x10e   :  { %v216_v39 = vpop.f32.mrf.mxu2 }
 0x10f   :  { %v219_v40 = vadd.f32 %v216_v39, %v167_v38 }
 0x110   :  { %v169_v42 = vpop.f32.mrf.mxu0 }
 0x111   :  { %544 = vtanh.f32 %v219_v40  ;;  %v170_v43 = vadd.f32 %v812_v37, %v169_v42 }
 0x117   :  { %v545_v41 = vpop.eup %544 }
 0x118   :  { %510 = vmatmul.msk.f32.vlgmr.msra.gmra.mxu2 %vm195_vm2, %v545_v41  ;;  %v172_v47 = vpop.f32.mrf.mxu0 }
 0x119   :  { %386 = vmatpush.msra.mxu2 %v750_v10  ;;  %v173_v48 = vadd.f32 %v812_v37, %v172_v47 }
 0x11b   :  { %387 = vmatpush.msra.mxu2 %v755_v11 }
 0x11d   :  { %388 = vmatpush.msra.mxu2 %v762_v12 }
 0x11f   :  { %389 = vmatpush.msra.mxu2 %v773_v13 }
 0x120   :  { %v175_v52 = vpop.f32.mrf.mxu0 }
 0x121   :  { %v176_v53 = vadd.f32 %v812_v37, %v175_v52 }
 0x128   :  { %v178_v61 = vpop.f32.mrf.mxu0 }
 0x129   :  { %v179_v62 = vadd.f32 %v812_v37, %v178_v61 }
 0x130   :  { %v181_v2 = vpop.f32.mrf.mxu0 }
 0x131   :  { %v182_v3 = vadd.f32 %v812_v37, %v181_v2 }
 0x138   :  { %v184_v10 = vpop.f32.mrf.mxu0 }
 0x139   :  { %v185_v11 = vadd.f32 %v812_v37, %v184_v10 }
 0x19b   :  { %v241_v44 = vpop.f32.mrf.mxu2 }
 0x19c   :  { %v244_v45 = vadd.f32 %v241_v44, %v170_v43 }
 0x19e   :  { %546 = vtanh.f32 %v244_v45 }
 0x1a4   :  { %v547_v46 = vpop.eup %546 }
 0x1a5   :  { %511 = vmatmul.msk.f32.vlgmr.msra.gmra.mxu3 %vm195_vm2, %v547_v46 }
 0x1a6   :  { %527 = vmatpush.msra.mxu3 %v400_v57 }
 0x1a8   :  { %528 = vmatpush.msra.mxu3 %v399_v58 }
 0x1aa   :  { %529 = vmatpush.msra.mxu3 %v398_v59 }
 0x1ac   :  { %530 = vmatpush.msra.mxu3 %v397_v60 }
 0x228   :  { %v266_v49 = vpop.f32.mrf.mxu3 }
 0x229   :  { %v269_v50 = vadd.f32 %v266_v49, %v173_v48 }
 0x22b   :  { %548 = vtanh.f32 %v269_v50 }
 0x231   :  { %v549_v51 = vpop.eup %548 }
 0x232   :  { %512 = vmatmul.msk.f32.vlgmr.msra.gmra.mxu1 %vm195_vm2, %v549_v51 }
 0x233   :  { %420 = vmatpush.msra.mxu1 %v400_v57 }
 0x235   :  { %421 = vmatpush.msra.mxu1 %v399_v58 }
 0x237   :  { %422 = vmatpush.msra.mxu1 %v398_v59 }
 0x239   :  { %423 = vmatpush.msra.mxu1 %v397_v60 }
 0x2af   :  { %v291_v54 = vpop.f32.mrf.mxu1 }
 0x2b0   :  { %v294_v55 = vadd.f32 %v291_v54, %v176_v53 }
 0x2b2   :  { %550 = vtanh.f32 %v294_v55 }
 0x2b8   :  { %v551_v56 = vpop.eup %550 }
 0x2b9   :  { %513 = vmatmul.msk.f32.vlgmr.msrb.gmra.mxu2 %vm195_vm2, %v551_v56 }
 0x33c   :  { %v316_v63 = vpop.f32.mrf.mxu2 }
 0x33d   :  { %v319_v0 = vadd.f32 %v316_v63, %v179_v62 }
 0x33f   :  { %552 = vtanh.f32 %v319_v0 }
 0x345   :  { %v553_v1 = vpop.eup %552 }
 0x346   :  { %514 = vmatmul.msk.f32.vlgmr.msrb.gmra.mxu3 %vm195_vm2, %v553_v1 }
 0x34e   :  { %521 = vmatmul.msk.f32.vlgmr.msra.gmra.mxu3 %vm195_vm2, %v553_v1 }
 0x3c9   :  { %v341_v4 = vpop.f32.mrf.mxu3 }
 0x3ca   :  { %v344_v5 = vadd.f32 %v341_v4, %v182_v3 }
 0x3cc   :  { %554 = vtanh.f32 %v344_v5 }
 0x3d1   :  { %v437_v7 = vpop.f32.mrf.mxu3 }
 0x3d2   :  { %v555_v8 = vpop.eup %554  ;;  %v438_v9 = vadd.f32 %v543_v6, %v437_v7 }
 0x3d3   :  { %515 = vmatmul.msk.f32.vlgmr.msrb.gmra.mxu1 %vm195_vm2, %v555_v8  ;;  %522 = vmatmul.msk.f32.gmra.mxu3 %vm195_vm2, %v555_v8 }
 0x3d4   :  { %453 = vst [vmem:[#allocation7 + $0x20] sm:$0xff] %v438_v9 }
 0x3db   :  { %517 = vmatmul.msk.f32.vlgmr.msra.gmra.mxu1 %vm195_vm2, %v545_v41 }
 0x3e3   :  { %518 = vmatmul.msk.f32.gmra.mxu1 %vm195_vm2, %v547_v46 }
 0x3eb   :  { %519 = vmatmul.msk.f32.gmra.mxu1 %vm195_vm2, %v549_v51 }
 0x3f3   :  { %520 = vmatmul.msk.f32.gmra.mxu1 %vm195_vm2, %v551_v56 }
 0x450   :  { %v366_v12 = vpop.f32.mrf.mxu1 }
 0x451   :  { %v369_v13 = vadd.f32 %v366_v12, %v185_v11 }
 0x453   :  { %556 = vtanh.f32 %v369_v13 }
 0x456   :  { %v440_v14 = vpop.f32.mrf.mxu3 }
 0x457   :  { %v441_v15 = vadd.f32 %v543_v6, %v440_v14 }
 0x458   :  { %v425_v16 = vpop.f32.mrf.mxu1 }
 0x459   :  { %v557_v17 = vpop.eup %556  ;;  %454 = vst [vmem:[#allocation7 + $0x28] sm:$0xff] %v441_v15  ;;  %v426_v18 = vadd.f32 %v543_v6, %v425_v16 }
 0x45a   :  { %516 = vmatmul.msk.f32.vlgmr.msra.gmra.mxu2 %vm195_vm2, %v557_v17  ;;  %523 = vmatmul.msk.f32.gmra.mxu3 %vm195_vm2, %v557_v17 }
 0x45b   :  { %449 = vst [vmem:[#allocation7] sm:$0xff] %v426_v18 }
 0x460   :  { %v428_v19 = vpop.f32.mrf.mxu1 }
 0x461   :  { %v429_v20 = vadd.f32 %v543_v6, %v428_v19 }
 0x463   :  { %450 = vst [vmem:[#allocation7 + $0x8] sm:$0xff] %v429_v20 }
 0x468   :  { %v431_v21 = vpop.f32.mrf.mxu1 }
 0x469   :  { %v432_v22 = vadd.f32 %v543_v6, %v431_v21 }
 0x46b   :  { %451 = vst [vmem:[#allocation7 + $0x10] sm:$0xff] %v432_v22 }
 0x470   :  { %v434_v23 = vpop.f32.mrf.mxu1 }
 0x471   :  { %v435_v24 = vadd.f32 %v543_v6, %v434_v23 }
 0x473   :  { %452 = vst [vmem:[#allocation7 + $0x18] sm:$0xff] %v435_v24 }
 0x4dd   :  { %v391_v26 = vpop.f32.mrf.mxu2  ;;  %v443_v27 = vpop.f32.mrf.mxu3 }
 0x4de   :  { %v394_v28 = vadd.f32 %v391_v26, %v188_v25  ;;  %v444_v29 = vadd.f32 %v543_v6, %v443_v27 }
 0x4e0   :  { %558 = vtanh.f32 %v394_v28  ;;  %455 = vst [vmem:[#allocation7 + $0x30] sm:$0xff] %v444_v29 }
 0x4e6   :  { %v559_v30 = vpop.eup %558 }
 0x4e7   :  { %396 = vst.msk [vmem:[#allocation8] sm:$0xff] %vm195_vm2, %v559_v30  ;;  %524 = vmatmul.msk.f32.gmra.mxu3 %vm195_vm2, %v559_v30 }
 0x4e8   :  { %480 = dma.vmem_to_hbm [thread:$0]  %s476_s25, 128, %s478_s28, [#allocation9]  }
 0x56a   :  { %v446_v31 = vpop.f32.mrf.mxu3 }
 0x56b   :  { %v447_v32 = vadd.f32 %v543_v6, %v446_v31 }
 0x56d   :  { %456 = vst [vmem:[#allocation7 + $0x38] sm:$0xff] %v447_v32 }
 0x56e   :  { %469 = dma.vmem_to_hbm [thread:$0]  %s462_s30, 1024, %s464_s11, [#allocation4], %s666_s15, %s666_s15, %s667_s16  }
 0x56f   :  { %660 = dma.done.wait [#allocation4], 1024  }
 0x570   :  { %661 = vsyncadd [#allocation4], 4294966272 }
 0x571   :  { %662 = dma.done.wait [#allocation9], 128  }
 0x572   :  { %663 = vsyncadd [#allocation9], 4294967168 }
 0x573   :  { %489 = vsyncpa [#allocation3], 1 }
 0x574   :  { %490 = vsyncpa [#allocation6], 1 }
 0x575   :  { %491 = vsyncpa [#allocation4], 1 }
 0x576   :  { %492 = vsyncpa [#allocation9], 1 }

</bundles_post_ra>
